<compile_context>
chip_gen: v7x
topology: tpu7x:2x2x1
jax: 0.10.0
libtpu: 0.0.40
codegen_flags: <defaults>
</compile_context>

<pallas_src>
import functools

import jax
import jax.numpy as jnp
from jax.experimental import pallas as pl
from jax.experimental.pallas import tpu as pltpu


# ----------------------------- Pallas kernel ------------------------------ #
def _lbcs_kernel(heads_raw_ref, ratios_raw_ref, pauli_ref, coeffs_ref,
                 loss_ref, heads_out_ref, ratios_out_ref):
    # heads_raw_ref : (Q, S, P)      raw heads parameter (q leading)
    # ratios_raw_ref: (S, 1)         raw head-ratio parameter
    # pauli_ref     : (Q, P, TILE_N) pauli tile, N on lanes
    # coeffs_ref    : (1, TILE_N)    coefficients, N on lanes
    # loss_ref      : (1, 1)         accumulated scalar loss (resident)
    # heads_out_ref : (Q, S, P)      activated + L1-normalised heads (resident)
    # ratios_out_ref: (S, 1)         activated + L1-normalised ratios (resident)
    i = pl.program_id(0)
    q_dim, s_dim, p_dim = heads_raw_ref.shape

    def _softplus(x):
        # numerically-stable softplus == log(1 + exp(x))
        return jnp.maximum(x, 0.0) + jnp.log(1.0 + jnp.exp(-jnp.abs(x)))

    # --- fused parameter transforms, done once on the first grid step ------ #
    @pl.when(i == 0)
    def _init():
        h = _softplus(heads_raw_ref[...] * 20.0)                     # (Q,S,P)
        h_norm = jnp.maximum(jnp.sum(h, axis=-1, keepdims=True), 1e-12)
        heads_out_ref[...] = h / h_norm

        r = _softplus(ratios_raw_ref[...] * 20.0)                    # (S,1)
        r = r + (0.001 / s_dim / 1.001)
        r_norm = jnp.maximum(jnp.sum(r, axis=0, keepdims=True), 1e-12)
        ratios_out_ref[...] = r / r_norm

        loss_ref[...] = jnp.zeros_like(loss_ref)

    # --- coverage for this N tile ------------------------------------------ #
    # cov[s, n] = prod_q ( sum_p heads[s, q, p] * pauli[q, p, n] )
    cov = None
    for q in range(q_dim):                    # Q is small & static -> unrolled
        hq = heads_out_ref[q]                 # (S, P)      activated heads
        pq = pauli_ref[q]                     # (P, TILE_N) lane-dense pauli
        sc = hq[:, 0:1] * pq[0:1, :]          # (S, TILE_N) broadcast FMA
        for p in range(1, p_dim):
            sc = sc + hq[:, p:p + 1] * pq[p:p + 1, :]
        cov = sc if cov is None else cov * sc

    r_col = ratios_out_ref[...]                                     # (S, 1)
    coverage = jnp.sum(cov * r_col, axis=0, keepdims=True)          # (1, TILE_N)
    inv_cov = pl.reciprocal(coverage, approx=True)                  # EUP slot

    c = coeffs_ref[...]                                             # (1, TILE_N)
    tile_sum = jnp.sum(c * c * inv_cov, axis=1, keepdims=True)      # (1, 1)
    loss_ref[...] += tile_sum


# ------------------------------- Wrapper ----------------------------------- #
@functools.partial(jax.jit, static_argnames=("tile_n",))
def lbcs_forward_pallas(heads_raw, head_ratios_raw, batch_pauli_tensor,
                        batch_coeff, *, tile_n=2048):
    s, q, p = heads_raw.shape                       # (S, Q, P)
    n = batch_pauli_tensor.shape[0]

    # Lane-dense layouts for the kernel.
    pauli_t = jnp.transpose(batch_pauli_tensor.astype(jnp.float32),
                            (1, 2, 0))              # (Q, P, N)
    coeffs = batch_coeff.astype(jnp.float32).reshape(1, n)
    heads_qsp = jnp.transpose(heads_raw.astype(jnp.float32), (1, 0, 2))  # (Q,S,P)
    ratios_col = head_ratios_raw.astype(jnp.float32).reshape(s, 1)

    if n <= tile_n:
        blk_n, n_pad = n, n
    else:
        blk_n = tile_n
        assert blk_n % 128 == 0, "tile_n must be a multiple of 128 when gridded"
        n_pad = ((n + blk_n - 1) // blk_n) * blk_n
        if n_pad != n:
            # pauli padded with 1.0 -> coverage == 1 for padded rows;
            # coeff padded with 0.0 -> padded rows contribute exactly 0.
            pauli_t = jnp.pad(pauli_t, ((0, 0), (0, 0), (0, n_pad - n)),
                              constant_values=1.0)
            coeffs = jnp.pad(coeffs, ((0, 0), (0, n_pad - n)),
                             constant_values=0.0)
    grid = n_pad // blk_n

    cost = pl.CostEstimate(
        flops=int(n_pad * (2 * q * p * s + 2 * q * s + 3 * s + 4)),
        transcendentals=int(n_pad + q * s * p + s),
        bytes_accessed=int(4 * (q * p * n_pad + n_pad + 2 * q * s * p + 2 * s + 1)),
    )

    loss2d, heads_qsp_act, ratios_col_act = pl.pallas_call(
        _lbcs_kernel,
        grid=(grid,),
        in_specs=[
            pl.BlockSpec((q, s, p), lambda i: (0, 0, 0)),       # raw heads
            pl.BlockSpec((s, 1), lambda i: (0, 0)),             # raw ratios
            pl.BlockSpec((q, p, blk_n), lambda i: (0, 0, i)),   # pauli tile
            pl.BlockSpec((1, blk_n), lambda i: (0, i)),         # coeff tile
        ],
        out_specs=[
            pl.BlockSpec((1, 1), lambda i: (0, 0)),             # loss (acc)
            pl.BlockSpec((q, s, p), lambda i: (0, 0, 0)),       # heads_act
            pl.BlockSpec((s, 1), lambda i: (0, 0)),             # ratios_act
        ],
        out_shape=(
            jax.ShapeDtypeStruct((1, 1), jnp.float32),
            jax.ShapeDtypeStruct((q, s, p), jnp.float32),
            jax.ShapeDtypeStruct((s, 1), jnp.float32),
        ),
        compiler_params=pltpu.CompilerParams(
            dimension_semantics=("arbitrary",)),
        cost_estimate=cost,
    )(heads_qsp, ratios_col, pauli_t, coeffs)

    loss = loss2d[0, 0]
    heads_act = jnp.transpose(heads_qsp_act, (1, 0, 2))          # (S, Q, P)
    ratios_act = ratios_col_act.reshape(s)                       # (S,)
    return loss, ratios_act, heads_act


# ------------------------- Module (parameter holder) ----------------------- #
class LargeLBCSPallas:
    def __init__(self, init_head_ratios, init_heads, freeze_heads=False):
        self.head_ratios = jnp.asarray(init_head_ratios, jnp.float32)  # (S,)
        self.heads = jnp.asarray(init_heads, jnp.float32)              # (S,Q,P)
        self.n_heads = self.heads.shape[0]

    def __call__(self, batch_pauli_tensor, batch_coeff, tile_n=2048):
        return lbcs_forward_pallas(self.heads, self.head_ratios,
                                   batch_pauli_tensor, batch_coeff,
                                   tile_n=tile_n)


# ------------------------------- References -------------------------------- #
def _params_ref(heads_raw, ratios_raw):
    heads = jax.nn.softplus(heads_raw * 20.0)
    heads = heads / jnp.maximum(
        jnp.sum(jnp.abs(heads), axis=-1, keepdims=True), 1e-12)
    r = jax.nn.softplus(ratios_raw * 20.0)
    r = r + 0.001 / heads_raw.shape[0] / 1.001
    r = r / jnp.maximum(jnp.sum(jnp.abs(r), axis=0, keepdims=True), 1e-12)
    return heads, r


def _loss_ref(heads, head_ratios, no_zero_pauliwords, coeffs):
    sc = jnp.einsum("nqp,sqp->nsq", no_zero_pauliwords, heads)
    cov = jnp.prod(sc, axis=-1)
    coverage = jnp.einsum("s,ns->n", head_ratios, cov)
    return jnp.sum((1.0 / coverage) * coeffs ** 2)


# --------------------------------- Main ------------------------------------ #
if __name__ == "__main__":
    key = jax.random.PRNGKey(0)
    k1, k2, k3, k4, k5, k6 = jax.random.split(key, 6)

    S, Q, P = 8, 8, 3     # heads, qubits, Pauli bases
    N = 16                # small batch of Pauli words

    init_heads = 0.1 * jax.random.normal(k1, (S, Q, P), jnp.float32)
    init_head_ratios = 0.1 * jax.random.normal(k2, (S,), jnp.float32)

    # "no_zero_pauliwords": strictly positive so coverage > 0
    batch_pauli_tensor = jax.random.uniform(
        k3, (N, Q, P), jnp.float32, minval=0.1, maxval=1.0)
    batch_coeff = jax.random.normal(k4, (N,), jnp.float32)

    model = LargeLBCSPallas(init_head_ratios, init_heads)

    # --- small, single-block path ------------------------------------------ #
    loss_val, head_ratios, heads = model(batch_pauli_tensor, batch_coeff)
    loss_val = jax.block_until_ready(loss_val)

    heads_ref, ratios_ref = _params_ref(model.heads, model.head_ratios)
    assert jnp.allclose(heads, heads_ref, rtol=1e-4, atol=1e-6)
    assert jnp.allclose(head_ratios, ratios_ref, rtol=1e-4, atol=1e-6)
    ref = _loss_ref(heads_ref, ratios_ref, batch_pauli_tensor, batch_coeff)
    assert jnp.allclose(loss_val, ref, rtol=2e-3, atol=1e-5), (loss_val, ref)

    # --- gridded / padded path (multi-step accumulation over N) ------------- #
    N2 = 500
    pauli2 = jax.random.uniform(k5, (N2, Q, P), jnp.float32,
                                minval=0.1, maxval=1.0)
    coeff2 = jax.random.normal(k6, (N2,), jnp.float32)
    loss2, ratios2, heads2 = model(pauli2, coeff2, tile_n=128)
    loss2 = jax.block_until_ready(loss2)
    ref2 = _loss_ref(heads_ref, ratios_ref, pauli2, coeff2)
    assert jnp.allclose(loss2, ref2, rtol=2e-3, atol=1e-5), (loss2, ref2)

    print("KERNEL_OK")
</pallas_src>

<mosaic_0001>
module attributes {stable_mosaic.version = 11 : i64} {
  func.func @_lbcs_kernel(%arg0: i32, %arg1: memref<8x8x3xf32, #tpu.memory_space<vmem>>, %arg2: memref<8x1xf32, #tpu.memory_space<vmem>>, %arg3: memref<8x3x16xf32, #tpu.memory_space<vmem>>, %arg4: memref<1x16xf32, #tpu.memory_space<vmem>>, %arg5: memref<1x1xf32, #tpu.memory_space<vmem>>, %arg6: memref<8x8x3xf32, #tpu.memory_space<vmem>>, %arg7: memref<8x1xf32, #tpu.memory_space<vmem>>) attributes {dimension_semantics = [#tpu.dimension_semantics<arbitrary>], iteration_bounds = array<i64: 1>, scalar_prefetch = 0 : i64, scratch_operands = 0 : i64, tpu.core_type = #tpu.core_type<tc>, window_params = [{pipeline_mode = #tpu.pipeline_mode<synchronous>, transform_indices = @transform_0, window_bounds = array<i64: 8, 8, 3>}, {pipeline_mode = #tpu.pipeline_mode<synchronous>, transform_indices = @transform_1, window_bounds = array<i64: 8, 1>}, {transform_indices = @transform_2, window_bounds = array<i64: 8, 3, 16>}, {transform_indices = @transform_3, window_bounds = array<i64: 1, 16>}, {pipeline_mode = #tpu.pipeline_mode<synchronous>, transform_indices = @transform_4, window_bounds = array<i64: 1, 1>}, {pipeline_mode = #tpu.pipeline_mode<synchronous>, transform_indices = @transform_5, window_bounds = array<i64: 8, 8, 3>}, {pipeline_mode = #tpu.pipeline_mode<synchronous>, transform_indices = @transform_6, window_bounds = array<i64: 8, 1>}]} {
    %c0_i32 = arith.constant 0 : i32
    %0 = arith.cmpi eq, %arg0, %c0_i32 : i32
    %1 = arith.extui %0 : i1 to i32
    %c0_i32_0 = arith.constant 0 : i32
    %2 = arith.cmpi ne, %1, %c0_i32_0 : i32
    scf.if %2 {
      %c0_50 = arith.constant 0 : index
      %c0_51 = arith.constant 0 : index
      %c0_52 = arith.constant 0 : index
      %192 = vector.load %arg1[%c0_50, %c0_51, %c0_52] : memref<8x8x3xf32, #tpu.memory_space<vmem>>, vector<8x8x3xf32>
      %cst_53 = arith.constant 2.000000e+01 : f32
      %193 = vector.broadcast %cst_53 : f32 to vector<8x8x3xf32>
      %194 = arith.mulf %192, %193 : vector<8x8x3xf32>
      %cst_54 = arith.constant 0.000000e+00 : f32
      %195 = vector.broadcast %cst_54 : f32 to vector<8x8x3xf32>
      %196 = arith.maximumf %194, %195 : vector<8x8x3xf32>
      %197 = math.absf %194 : vector<8x8x3xf32>
      %cst_55 = arith.constant 0.000000e+00 : f32
      %198 = vector.broadcast %cst_55 : f32 to vector<8x8x3xf32>
      %199 = arith.subf %198, %197 : vector<8x8x3xf32>
      %200 = math.exp %199 : vector<8x8x3xf32>
      %cst_56 = arith.constant 1.000000e+00 : f32
      %201 = vector.broadcast %cst_56 : f32 to vector<8x8x3xf32>
      %202 = arith.addf %201, %200 : vector<8x8x3xf32>
      %203 = math.log %202 : vector<8x8x3xf32>
      %204 = arith.addf %196, %203 : vector<8x8x3xf32>
      %cst_57 = arith.constant dense<0.000000e+00> : vector<8x8xf32>
      %205 = vector.multi_reduction <add>, %204, %cst_57 [2] : vector<8x8x3xf32> to vector<8x8xf32>
      %206 = vector.shape_cast %205 : vector<8x8xf32> to vector<8x8x1xf32>
      %cst_58 = arith.constant 9.99999996E-13 : f32
      %207 = vector.broadcast %cst_58 : f32 to vector<8x8x1xf32>
      %208 = arith.maximumf %206, %207 : vector<8x8x1xf32>
      %209 = vector.broadcast %208 : vector<8x8x1xf32> to vector<8x8x3xf32>
      %210 = arith.divf %204, %209 : vector<8x8x3xf32>
      %c0_59 = arith.constant 0 : index
      %c0_60 = arith.constant 0 : index
      %c0_61 = arith.constant 0 : index
      %211 = vector.load %arg6[%c0_59, %c0_60, %c0_61] : memref<8x8x3xf32, #tpu.memory_space<vmem>>, vector<8x8x3xf32>
      tpu.vector_store %arg6[%c0_59, %c0_60, %c0_61], %210 {strides = array<i32>} : memref<8x8x3xf32, #tpu.memory_space<vmem>>, vector<8x8x3xf32>,
      %c0_62 = arith.constant 0 : index
      %c0_63 = arith.constant 0 : index
      %212 = vector.load %arg2[%c0_62, %c0_63] : memref<8x1xf32, #tpu.memory_space<vmem>>, vector<8x1xf32>
      %cst_64 = arith.constant 2.000000e+01 : f32
      %213 = vector.broadcast %cst_64 : f32 to vector<8x1xf32>
      %214 = arith.mulf %212, %213 : vector<8x1xf32>
      %cst_65 = arith.constant 0.000000e+00 : f32
      %215 = vector.broadcast %cst_65 : f32 to vector<8x1xf32>
      %216 = arith.maximumf %214, %215 : vector<8x1xf32>
      %217 = math.absf %214 : vector<8x1xf32>
      %cst_66 = arith.constant 0.000000e+00 : f32
      %218 = vector.broadcast %cst_66 : f32 to vector<8x1xf32>
      %219 = arith.subf %218, %217 : vector<8x1xf32>
      %220 = math.exp %219 : vector<8x1xf32>
      %cst_67 = arith.constant 1.000000e+00 : f32
      %221 = vector.broadcast %cst_67 : f32 to vector<8x1xf32>
      %222 = arith.addf %221, %220 : vector<8x1xf32>
      %223 = math.log %222 : vector<8x1xf32>
      %224 = arith.addf %216, %223 : vector<8x1xf32>
      %cst_68 = arith.constant 1.24875121E-4 : f32
      %225 = vector.broadcast %cst_68 : f32 to vector<8x1xf32>
      %226 = arith.addf %224, %225 : vector<8x1xf32>
      %cst_69 = arith.constant dense<0.000000e+00> : vector<1xf32>
      %227 = vector.multi_reduction <add>, %226, %cst_69 [0] : vector<8x1xf32> to vector<1xf32>
      %228 = vector.shape_cast %227 : vector<1xf32> to vector<1x1xf32>
      %cst_70 = arith.constant 9.99999996E-13 : f32
      %229 = vector.broadcast %cst_70 : f32 to vector<1x1xf32>
      %230 = arith.maximumf %228, %229 : vector<1x1xf32>
      %231 = vector.broadcast %230 : vector<1x1xf32> to vector<8x1xf32>
      %232 = arith.divf %226, %231 : vector<8x1xf32>
      %c0_71 = arith.constant 0 : index
      %c0_72 = arith.constant 0 : index
      %233 = vector.load %arg7[%c0_71, %c0_72] : memref<8x1xf32, #tpu.memory_space<vmem>>, vector<8x1xf32>
      tpu.vector_store %arg7[%c0_71, %c0_72], %232 {strides = array<i32>} : memref<8x1xf32, #tpu.memory_space<vmem>>, vector<8x1xf32>,
      %cst_73 = arith.constant 0.000000e+00 : f32
      %234 = vector.broadcast %cst_73 : f32 to vector<1x1xf32>
      %c0_74 = arith.constant 0 : index
      %c0_75 = arith.constant 0 : index
      %235 = vector.load %arg5[%c0_74, %c0_75] : memref<1x1xf32, #tpu.memory_space<vmem>>, vector<1x1xf32>
      tpu.vector_store %arg5[%c0_74, %c0_75], %234 {strides = array<i32>} : memref<1x1xf32, #tpu.memory_space<vmem>>, vector<1x1xf32>,
    } else {
    }
    %c0 = arith.constant 0 : index
    %c0_1 = arith.constant 0 : index
    %c0_2 = arith.constant 0 : index
    %3 = vector.load %arg6[%c0, %c0_1, %c0_2] : memref<8x8x3xf32, #tpu.memory_space<vmem>>, vector<1x8x3xf32>
    %4 = vector.shape_cast %3 : vector<1x8x3xf32> to vector<8x3xf32>
    %c0_3 = arith.constant 0 : index
    %c0_4 = arith.constant 0 : index
    %c0_5 = arith.constant 0 : index
    %5 = vector.load %arg3[%c0_3, %c0_4, %c0_5] : memref<8x3x16xf32, #tpu.memory_space<vmem>>, vector<1x3x16xf32>
    %6 = vector.shape_cast %5 : vector<1x3x16xf32> to vector<3x16xf32>
    %7 = vector.extract_strided_slice %4 {offsets = [0, 0], sizes = [8, 1], strides = [1, 1]} : vector<8x3xf32> to vector<8x1xf32>
    %8 = vector.extract_strided_slice %6 {offsets = [0, 0], sizes = [1, 16], strides = [1, 1]} : vector<3x16xf32> to vector<1x16xf32>
    %9 = vector.broadcast %7 : vector<8x1xf32> to vector<8x16xf32>
    %10 = vector.broadcast %8 : vector<1x16xf32> to vector<8x16xf32>
    %11 = arith.mulf %9, %10 : vector<8x16xf32>
    %12 = vector.extract_strided_slice %4 {offsets = [0, 1], sizes = [8, 1], strides = [1, 1]} : vector<8x3xf32> to vector<8x1xf32>
    %13 = vector.extract_strided_slice %6 {offsets = [1, 0], sizes = [1, 16], strides = [1, 1]} : vector<3x16xf32> to vector<1x16xf32>
    %14 = vector.broadcast %12 : vector<8x1xf32> to vector<8x16xf32>
    %15 = vector.broadcast %13 : vector<1x16xf32> to vector<8x16xf32>
    %16 = arith.mulf %14, %15 : vector<8x16xf32>
    %17 = arith.addf %11, %16 : vector<8x16xf32>
    %18 = vector.extract_strided_slice %4 {offsets = [0, 2], sizes = [8, 1], strides = [1, 1]} : vector<8x3xf32> to vector<8x1xf32>
    %19 = vector.extract_strided_slice %6 {offsets = [2, 0], sizes = [1, 16], strides = [1, 1]} : vector<3x16xf32> to vector<1x16xf32>
    %20 = vector.broadcast %18 : vector<8x1xf32> to vector<8x16xf32>
    %21 = vector.broadcast %19 : vector<1x16xf32> to vector<8x16xf32>
    %22 = arith.mulf %20, %21 : vector<8x16xf32>
    %23 = arith.addf %17, %22 : vector<8x16xf32>
    %c1 = arith.constant 1 : index
    %c0_6 = arith.constant 0 : index
    %c0_7 = arith.constant 0 : index
    %24 = vector.load %arg6[%c1, %c0_6, %c0_7] : memref<8x8x3xf32, #tpu.memory_space<vmem>>, vector<1x8x3xf32>
    %25 = vector.shape_cast %24 : vector<1x8x3xf32> to vector<8x3xf32>
    %c1_8 = arith.constant 1 : index
    %c0_9 = arith.constant 0 : index
    %c0_10 = arith.constant 0 : index
    %26 = vector.load %arg3[%c1_8, %c0_9, %c0_10] : memref<8x3x16xf32, #tpu.memory_space<vmem>>, vector<1x3x16xf32>
    %27 = vector.shape_cast %26 : vector<1x3x16xf32> to vector<3x16xf32>
    %28 = vector.extract_strided_slice %25 {offsets = [0, 0], sizes = [8, 1], strides = [1, 1]} : vector<8x3xf32> to vector<8x1xf32>
    %29 = vector.extract_strided_slice %27 {offsets = [0, 0], sizes = [1, 16], strides = [1, 1]} : vector<3x16xf32> to vector<1x16xf32>
    %30 = vector.broadcast %28 : vector<8x1xf32> to vector<8x16xf32>
    %31 = vector.broadcast %29 : vector<1x16xf32> to vector<8x16xf32>
    %32 = arith.mulf %30, %31 : vector<8x16xf32>
    %33 = vector.extract_strided_slice %25 {offsets = [0, 1], sizes = [8, 1], strides = [1, 1]} : vector<8x3xf32> to vector<8x1xf32>
    %34 = vector.extract_strided_slice %27 {offsets = [1, 0], sizes = [1, 16], strides = [1, 1]} : vector<3x16xf32> to vector<1x16xf32>
    %35 = vector.broadcast %33 : vector<8x1xf32> to vector<8x16xf32>
    %36 = vector.broadcast %34 : vector<1x16xf32> to vector<8x16xf32>
    %37 = arith.mulf %35, %36 : vector<8x16xf32>
    %38 = arith.addf %32, %37 : vector<8x16xf32>
    %39 = vector.extract_strided_slice %25 {offsets = [0, 2], sizes = [8, 1], strides = [1, 1]} : vector<8x3xf32> to vector<8x1xf32>
    %40 = vector.extract_strided_slice %27 {offsets = [2, 0], sizes = [1, 16], strides = [1, 1]} : vector<3x16xf32> to vector<1x16xf32>
    %41 = vector.broadcast %39 : vector<8x1xf32> to vector<8x16xf32>
    %42 = vector.broadcast %40 : vector<1x16xf32> to vector<8x16xf32>
    %43 = arith.mulf %41, %42 : vector<8x16xf32>
    %44 = arith.addf %38, %43 : vector<8x16xf32>
    %45 = arith.mulf %23, %44 : vector<8x16xf32>
    %c2 = arith.constant 2 : index
    %c0_11 = arith.constant 0 : index
    %c0_12 = arith.constant 0 : index
    %46 = vector.load %arg6[%c2, %c0_11, %c0_12] : memref<8x8x3xf32, #tpu.memory_space<vmem>>, vector<1x8x3xf32>
    %47 = vector.shape_cast %46 : vector<1x8x3xf32> to vector<8x3xf32>
    %c2_13 = arith.constant 2 : index
    %c0_14 = arith.constant 0 : index
    %c0_15 = arith.constant 0 : index
    %48 = vector.load %arg3[%c2_13, %c0_14, %c0_15] : memref<8x3x16xf32, #tpu.memory_space<vmem>>, vector<1x3x16xf32>
    %49 = vector.shape_cast %48 : vector<1x3x16xf32> to vector<3x16xf32>
    %50 = vector.extract_strided_slice %47 {offsets = [0, 0], sizes = [8, 1], strides = [1, 1]} : vector<8x3xf32> to vector<8x1xf32>
    %51 = vector.extract_strided_slice %49 {offsets = [0, 0], sizes = [1, 16], strides = [1, 1]} : vector<3x16xf32> to vector<1x16xf32>
    %52 = vector.broadcast %50 : vector<8x1xf32> to vector<8x16xf32>
    %53 = vector.broadcast %51 : vector<1x16xf32> to vector<8x16xf32>
    %54 = arith.mulf %52, %53 : vector<8x16xf32>
    %55 = vector.extract_strided_slice %47 {offsets = [0, 1], sizes = [8, 1], strides = [1, 1]} : vector<8x3xf32> to vector<8x1xf32>
    %56 = vector.extract_strided_slice %49 {offsets = [1, 0], sizes = [1, 16], strides = [1, 1]} : vector<3x16xf32> to vector<1x16xf32>
    %57 = vector.broadcast %55 : vector<8x1xf32> to vector<8x16xf32>
    %58 = vector.broadcast %56 : vector<1x16xf32> to vector<8x16xf32>
    %59 = arith.mulf %57, %58 : vector<8x16xf32>
    %60 = arith.addf %54, %59 : vector<8x16xf32>
    %61 = vector.extract_strided_slice %47 {offsets = [0, 2], sizes = [8, 1], strides = [1, 1]} : vector<8x3xf32> to vector<8x1xf32>
    %62 = vector.extract_strided_slice %49 {offsets = [2, 0], sizes = [1, 16], strides = [1, 1]} : vector<3x16xf32> to vector<1x16xf32>
    %63 = vector.broadcast %61 : vector<8x1xf32> to vector<8x16xf32>
    %64 = vector.broadcast %62 : vector<1x16xf32> to vector<8x16xf32>
    %65 = arith.mulf %63, %64 : vector<8x16xf32>
    %66 = arith.addf %60, %65 : vector<8x16xf32>
    %67 = arith.mulf %45, %66 : vector<8x16xf32>
    %c3 = arith.constant 3 : index
    %c0_16 = arith.constant 0 : index
    %c0_17 = arith.constant 0 : index
    %68 = vector.load %arg6[%c3, %c0_16, %c0_17] : memref<8x8x3xf32, #tpu.memory_space<vmem>>, vector<1x8x3xf32>
    %69 = vector.shape_cast %68 : vector<1x8x3xf32> to vector<8x3xf32>
    %c3_18 = arith.constant 3 : index
    %c0_19 = arith.constant 0 : index
    %c0_20 = arith.constant 0 : index
    %70 = vector.load %arg3[%c3_18, %c0_19, %c0_20] : memref<8x3x16xf32, #tpu.memory_space<vmem>>, vector<1x3x16xf32>
    %71 = vector.shape_cast %70 : vector<1x3x16xf32> to vector<3x16xf32>
    %72 = vector.extract_strided_slice %69 {offsets = [0, 0], sizes = [8, 1], strides = [1, 1]} : vector<8x3xf32> to vector<8x1xf32>
    %73 = vector.extract_strided_slice %71 {offsets = [0, 0], sizes = [1, 16], strides = [1, 1]} : vector<3x16xf32> to vector<1x16xf32>
    %74 = vector.broadcast %72 : vector<8x1xf32> to vector<8x16xf32>
    %75 = vector.broadcast %73 : vector<1x16xf32> to vector<8x16xf32>
    %76 = arith.mulf %74, %75 : vector<8x16xf32>
    %77 = vector.extract_strided_slice %69 {offsets = [0, 1], sizes = [8, 1], strides = [1, 1]} : vector<8x3xf32> to vector<8x1xf32>
    %78 = vector.extract_strided_slice %71 {offsets = [1, 0], sizes = [1, 16], strides = [1, 1]} : vector<3x16xf32> to vector<1x16xf32>
    %79 = vector.broadcast %77 : vector<8x1xf32> to vector<8x16xf32>
    %80 = vector.broadcast %78 : vector<1x16xf32> to vector<8x16xf32>
    %81 = arith.mulf %79, %80 : vector<8x16xf32>
    %82 = arith.addf %76, %81 : vector<8x16xf32>
    %83 = vector.extract_strided_slice %69 {offsets = [0, 2], sizes = [8, 1], strides = [1, 1]} : vector<8x3xf32> to vector<8x1xf32>
    %84 = vector.extract_strided_slice %71 {offsets = [2, 0], sizes = [1, 16], strides = [1, 1]} : vector<3x16xf32> to vector<1x16xf32>
    %85 = vector.broadcast %83 : vector<8x1xf32> to vector<8x16xf32>
    %86 = vector.broadcast %84 : vector<1x16xf32> to vector<8x16xf32>
    %87 = arith.mulf %85, %86 : vector<8x16xf32>
    %88 = arith.addf %82, %87 : vector<8x16xf32>
    %89 = arith.mulf %67, %88 : vector<8x16xf32>
    %c4 = arith.constant 4 : index
    %c0_21 = arith.constant 0 : index
    %c0_22 = arith.constant 0 : index
    %90 = vector.load %arg6[%c4, %c0_21, %c0_22] : memref<8x8x3xf32, #tpu.memory_space<vmem>>, vector<1x8x3xf32>
    %91 = vector.shape_cast %90 : vector<1x8x3xf32> to vector<8x3xf32>
    %c4_23 = arith.constant 4 : index
    %c0_24 = arith.constant 0 : index
    %c0_25 = arith.constant 0 : index
    %92 = vector.load %arg3[%c4_23, %c0_24, %c0_25] : memref<8x3x16xf32, #tpu.memory_space<vmem>>, vector<1x3x16xf32>
    %93 = vector.shape_cast %92 : vector<1x3x16xf32> to vector<3x16xf32>
    %94 = vector.extract_strided_slice %91 {offsets = [0, 0], sizes = [8, 1], strides = [1, 1]} : vector<8x3xf32> to vector<8x1xf32>
    %95 = vector.extract_strided_slice %93 {offsets = [0, 0], sizes = [1, 16], strides = [1, 1]} : vector<3x16xf32> to vector<1x16xf32>
    %96 = vector.broadcast %94 : vector<8x1xf32> to vector<8x16xf32>
    %97 = vector.broadcast %95 : vector<1x16xf32> to vector<8x16xf32>
    %98 = arith.mulf %96, %97 : vector<8x16xf32>
    %99 = vector.extract_strided_slice %91 {offsets = [0, 1], sizes = [8, 1], strides = [1, 1]} : vector<8x3xf32> to vector<8x1xf32>
    %100 = vector.extract_strided_slice %93 {offsets = [1, 0], sizes = [1, 16], strides = [1, 1]} : vector<3x16xf32> to vector<1x16xf32>
    %101 = vector.broadcast %99 : vector<8x1xf32> to vector<8x16xf32>
    %102 = vector.broadcast %100 : vector<1x16xf32> to vector<8x16xf32>
    %103 = arith.mulf %101, %102 : vector<8x16xf32>
    %104 = arith.addf %98, %103 : vector<8x16xf32>
    %105 = vector.extract_strided_slice %91 {offsets = [0, 2], sizes = [8, 1], strides = [1, 1]} : vector<8x3xf32> to vector<8x1xf32>
    %106 = vector.extract_strided_slice %93 {offsets = [2, 0], sizes = [1, 16], strides = [1, 1]} : vector<3x16xf32> to vector<1x16xf32>
    %107 = vector.broadcast %105 : vector<8x1xf32> to vector<8x16xf32>
    %108 = vector.broadcast %106 : vector<1x16xf32> to vector<8x16xf32>
    %109 = arith.mulf %107, %108 : vector<8x16xf32>
    %110 = arith.addf %104, %109 : vector<8x16xf32>
    %111 = arith.mulf %89, %110 : vector<8x16xf32>
    %c5 = arith.constant 5 : index
    %c0_26 = arith.constant 0 : index
    %c0_27 = arith.constant 0 : index
    %112 = vector.load %arg6[%c5, %c0_26, %c0_27] : memref<8x8x3xf32, #tpu.memory_space<vmem>>, vector<1x8x3xf32>
    %113 = vector.shape_cast %112 : vector<1x8x3xf32> to vector<8x3xf32>
    %c5_28 = arith.constant 5 : index
    %c0_29 = arith.constant 0 : index
    %c0_30 = arith.constant 0 : index
    %114 = vector.load %arg3[%c5_28, %c0_29, %c0_30] : memref<8x3x16xf32, #tpu.memory_space<vmem>>, vector<1x3x16xf32>
    %115 = vector.shape_cast %114 : vector<1x3x16xf32> to vector<3x16xf32>
    %116 = vector.extract_strided_slice %113 {offsets = [0, 0], sizes = [8, 1], strides = [1, 1]} : vector<8x3xf32> to vector<8x1xf32>
    %117 = vector.extract_strided_slice %115 {offsets = [0, 0], sizes = [1, 16], strides = [1, 1]} : vector<3x16xf32> to vector<1x16xf32>
    %118 = vector.broadcast %116 : vector<8x1xf32> to vector<8x16xf32>
    %119 = vector.broadcast %117 : vector<1x16xf32> to vector<8x16xf32>
    %120 = arith.mulf %118, %119 : vector<8x16xf32>
    %121 = vector.extract_strided_slice %113 {offsets = [0, 1], sizes = [8, 1], strides = [1, 1]} : vector<8x3xf32> to vector<8x1xf32>
    %122 = vector.extract_strided_slice %115 {offsets = [1, 0], sizes = [1, 16], strides = [1, 1]} : vector<3x16xf32> to vector<1x16xf32>
    %123 = vector.broadcast %121 : vector<8x1xf32> to vector<8x16xf32>
    %124 = vector.broadcast %122 : vector<1x16xf32> to vector<8x16xf32>
    %125 = arith.mulf %123, %124 : vector<8x16xf32>
    %126 = arith.addf %120, %125 : vector<8x16xf32>
    %127 = vector.extract_strided_slice %113 {offsets = [0, 2], sizes = [8, 1], strides = [1, 1]} : vector<8x3xf32> to vector<8x1xf32>
    %128 = vector.extract_strided_slice %115 {offsets = [2, 0], sizes = [1, 16], strides = [1, 1]} : vector<3x16xf32> to vector<1x16xf32>
    %129 = vector.broadcast %127 : vector<8x1xf32> to vector<8x16xf32>
    %130 = vector.broadcast %128 : vector<1x16xf32> to vector<8x16xf32>
    %131 = arith.mulf %129, %130 : vector<8x16xf32>
    %132 = arith.addf %126, %131 : vector<8x16xf32>
    %133 = arith.mulf %111, %132 : vector<8x16xf32>
    %c6 = arith.constant 6 : index
    %c0_31 = arith.constant 0 : index
    %c0_32 = arith.constant 0 : index
    %134 = vector.load %arg6[%c6, %c0_31, %c0_32] : memref<8x8x3xf32, #tpu.memory_space<vmem>>, vector<1x8x3xf32>
    %135 = vector.shape_cast %134 : vector<1x8x3xf32> to vector<8x3xf32>
    %c6_33 = arith.constant 6 : index
    %c0_34 = arith.constant 0 : index
    %c0_35 = arith.constant 0 : index
    %136 = vector.load %arg3[%c6_33, %c0_34, %c0_35] : memref<8x3x16xf32, #tpu.memory_space<vmem>>, vector<1x3x16xf32>
    %137 = vector.shape_cast %136 : vector<1x3x16xf32> to vector<3x16xf32>
    %138 = vector.extract_strided_slice %135 {offsets = [0, 0], sizes = [8, 1], strides = [1, 1]} : vector<8x3xf32> to vector<8x1xf32>
    %139 = vector.extract_strided_slice %137 {offsets = [0, 0], sizes = [1, 16], strides = [1, 1]} : vector<3x16xf32> to vector<1x16xf32>
    %140 = vector.broadcast %138 : vector<8x1xf32> to vector<8x16xf32>
    %141 = vector.broadcast %139 : vector<1x16xf32> to vector<8x16xf32>
    %142 = arith.mulf %140, %141 : vector<8x16xf32>
    %143 = vector.extract_strided_slice %135 {offsets = [0, 1], sizes = [8, 1], strides = [1, 1]} : vector<8x3xf32> to vector<8x1xf32>
    %144 = vector.extract_strided_slice %137 {offsets = [1, 0], sizes = [1, 16], strides = [1, 1]} : vector<3x16xf32> to vector<1x16xf32>
    %145 = vector.broadcast %143 : vector<8x1xf32> to vector<8x16xf32>
    %146 = vector.broadcast %144 : vector<1x16xf32> to vector<8x16xf32>
    %147 = arith.mulf %145, %146 : vector<8x16xf32>
    %148 = arith.addf %142, %147 : vector<8x16xf32>
    %149 = vector.extract_strided_slice %135 {offsets = [0, 2], sizes = [8, 1], strides = [1, 1]} : vector<8x3xf32> to vector<8x1xf32>
    %150 = vector.extract_strided_slice %137 {offsets = [2, 0], sizes = [1, 16], strides = [1, 1]} : vector<3x16xf32> to vector<1x16xf32>
    %151 = vector.broadcast %149 : vector<8x1xf32> to vector<8x16xf32>
    %152 = vector.broadcast %150 : vector<1x16xf32> to vector<8x16xf32>
    %153 = arith.mulf %151, %152 : vector<8x16xf32>
    %154 = arith.addf %148, %153 : vector<8x16xf32>
    %155 = arith.mulf %133, %154 : vector<8x16xf32>
    %c7 = arith.constant 7 : index
    %c0_36 = arith.constant 0 : index
    %c0_37 = arith.constant 0 : index
    %156 = vector.load %arg6[%c7, %c0_36, %c0_37] : memref<8x8x3xf32, #tpu.memory_space<vmem>>, vector<1x8x3xf32>
    %157 = vector.shape_cast %156 : vector<1x8x3xf32> to vector<8x3xf32>
    %c7_38 = arith.constant 7 : index
    %c0_39 = arith.constant 0 : index
    %c0_40 = arith.constant 0 : index
    %158 = vector.load %arg3[%c7_38, %c0_39, %c0_40] : memref<8x3x16xf32, #tpu.memory_space<vmem>>, vector<1x3x16xf32>
    %159 = vector.shape_cast %158 : vector<1x3x16xf32> to vector<3x16xf32>
    %160 = vector.extract_strided_slice %157 {offsets = [0, 0], sizes = [8, 1], strides = [1, 1]} : vector<8x3xf32> to vector<8x1xf32>
    %161 = vector.extract_strided_slice %159 {offsets = [0, 0], sizes = [1, 16], strides = [1, 1]} : vector<3x16xf32> to vector<1x16xf32>
    %162 = vector.broadcast %160 : vector<8x1xf32> to vector<8x16xf32>
    %163 = vector.broadcast %161 : vector<1x16xf32> to vector<8x16xf32>
    %164 = arith.mulf %162, %163 : vector<8x16xf32>
    %165 = vector.extract_strided_slice %157 {offsets = [0, 1], sizes = [8, 1], strides = [1, 1]} : vector<8x3xf32> to vector<8x1xf32>
    %166 = vector.extract_strided_slice %159 {offsets = [1, 0], sizes = [1, 16], strides = [1, 1]} : vector<3x16xf32> to vector<1x16xf32>
    %167 = vector.broadcast %165 : vector<8x1xf32> to vector<8x16xf32>
    %168 = vector.broadcast %166 : vector<1x16xf32> to vector<8x16xf32>
    %169 = arith.mulf %167, %168 : vector<8x16xf32>
    %170 = arith.addf %164, %169 : vector<8x16xf32>
    %171 = vector.extract_strided_slice %157 {offsets = [0, 2], sizes = [8, 1], strides = [1, 1]} : vector<8x3xf32> to vector<8x1xf32>
    %172 = vector.extract_strided_slice %159 {offsets = [2, 0], sizes = [1, 16], strides = [1, 1]} : vector<3x16xf32> to vector<1x16xf32>
    %173 = vector.broadcast %171 : vector<8x1xf32> to vector<8x16xf32>
    %174 = vector.broadcast %172 : vector<1x16xf32> to vector<8x16xf32>
    %175 = arith.mulf %173, %174 : vector<8x16xf32>
    %176 = arith.addf %170, %175 : vector<8x16xf32>
    %177 = arith.mulf %155, %176 : vector<8x16xf32>
    %c0_41 = arith.constant 0 : index
    %c0_42 = arith.constant 0 : index
    %178 = vector.load %arg7[%c0_41, %c0_42] : memref<8x1xf32, #tpu.memory_space<vmem>>, vector<8x1xf32>
    %179 = vector.broadcast %178 : vector<8x1xf32> to vector<8x16xf32>
    %180 = arith.mulf %177, %179 : vector<8x16xf32>
    %cst = arith.constant dense<0.000000e+00> : vector<16xf32>
    %181 = vector.multi_reduction <add>, %180, %cst [0] : vector<8x16xf32> to vector<16xf32>
    %182 = vector.shape_cast %181 : vector<16xf32> to vector<1x16xf32>
    %183 = tpu.reciprocal %182 {approx = true} : vector<1x16xf32> -> vector<1x16xf32>
    %c0_43 = arith.constant 0 : index
    %c0_44 = arith.constant 0 : index
    %184 = vector.load %arg4[%c0_43, %c0_44] : memref<1x16xf32, #tpu.memory_space<vmem>>, vector<1x16xf32>
    %185 = arith.mulf %184, %184 : vector<1x16xf32>
    %186 = arith.mulf %185, %183 : vector<1x16xf32>
    %cst_45 = arith.constant dense<0.000000e+00> : vector<1xf32>
    %187 = vector.multi_reduction <add>, %186, %cst_45 [1] : vector<1x16xf32> to vector<1xf32>
    %188 = vector.shape_cast %187 : vector<1xf32> to vector<1x1xf32>
    %c0_46 = arith.constant 0 : index
    %c0_47 = arith.constant 0 : index
    %189 = vector.load %arg5[%c0_46, %c0_47] : memref<1x1xf32, #tpu.memory_space<vmem>>, vector<1x1xf32>
    %190 = arith.addf %189, %188 : vector<1x1xf32>
    %c0_48 = arith.constant 0 : index
    %c0_49 = arith.constant 0 : index
    %191 = vector.load %arg5[%c0_48, %c0_49] : memref<1x1xf32, #tpu.memory_space<vmem>>, vector<1x1xf32>
    tpu.vector_store %arg5[%c0_48, %c0_49], %190 {strides = array<i32>} : memref<1x1xf32, #tpu.memory_space<vmem>>, vector<1x1xf32>,
    return
  }
  func.func @transform_0(%arg0: i32) -> (i32, i32, i32) {
    %c0_i32 = arith.constant 0 : i32
    %c0_i32_0 = arith.constant 0 : i32
    %c0_i32_1 = arith.constant 0 : i32
    %c0_i32_2 = arith.constant 0 : i32
    return %c0_i32, %c0_i32_0, %c0_i32_1 : i32, i32, i32
  }
  func.func @transform_1(%arg0: i32) -> (i32, i32) {
    %c0_i32 = arith.constant 0 : i32
    %c0_i32_0 = arith.constant 0 : i32
    %c0_i32_1 = arith.constant 0 : i32
    return %c0_i32, %c0_i32_0 : i32, i32
  }
  func.func @transform_2(%arg0: i32) -> (i32, i32, i32) {
    %c0_i32 = arith.constant 0 : i32
    %c0_i32_0 = arith.constant 0 : i32
    %c0_i32_1 = arith.constant 0 : i32
    return %c0_i32, %c0_i32_0, %arg0 : i32, i32, i32
  }
  func.func @transform_3(%arg0: i32) -> (i32, i32) {
    %c0_i32 = arith.constant 0 : i32
    %c0_i32_0 = arith.constant 0 : i32
    return %c0_i32, %arg0 : i32, i32
  }
  func.func @transform_4(%arg0: i32) -> (i32, i32) {
    %c0_i32 = arith.constant 0 : i32
    %c0_i32_0 = arith.constant 0 : i32
    %c0_i32_1 = arith.constant 0 : i32
    return %c0_i32, %c0_i32_0 : i32, i32
  }
  func.func @transform_5(%arg0: i32) -> (i32, i32, i32) {
    %c0_i32 = arith.constant 0 : i32
    %c0_i32_0 = arith.constant 0 : i32
    %c0_i32_1 = arith.constant 0 : i32
    %c0_i32_2 = arith.constant 0 : i32
    return %c0_i32, %c0_i32_0, %c0_i32_1 : i32, i32, i32
  }
  func.func @transform_6(%arg0: i32) -> (i32, i32) {
    %c0_i32 = arith.constant 0 : i32
    %c0_i32_0 = arith.constant 0 : i32
    %c0_i32_1 = arith.constant 0 : i32
    return %c0_i32, %c0_i32_0 : i32, i32
  }
}

</mosaic_0001>

<bundles_post_ra>
// kernel: lbcs_forward_pallas.1
= control target key start
LH: loop header
LB: loop body
LE: loop exit
PB: predicated region body
PF: predicated region fallthrough
CT: control target
= control target key end

     0   :  { %s927_s0 = inlined_call_operand.vmem [shape: f32[8,8,3], index: 0, kind: input, shape index: {}]   ;;  %s928_s1 = inlined_call_operand.vmem [shape: f32[8,1], index: 1, kind: input, shape index: {}]   ;;  %s929_s2 = inlined_call_operand.vmem [shape: f32[8,3,16], index: 2, kind: input, shape index: {}]   ;;  %s930_s3 = inlined_call_operand.vmem [shape: f32[1,16], index: 3, kind: input, shape index: {}]   ;;  %s931_s4 = inlined_call_operand.hbm [shape: f32[1,1], index: 4, kind: output, shape index: {0}]   ;;  %s932_s5 = inlined_call_operand.vmem [shape: f32[8,8,3], index: 5, kind: output, shape index: {1}]   ;;  %s933_s6 = inlined_call_operand.vmem [shape: f32[8,1], index: 6, kind: output, shape index: {2}]  }
   0x1   :  { %v25_v0 = vld [vmem:[%s927_s0] sm:$0xff]  ;;  %v26_v1 = vld [vmem:[%s927_s0 + $0x8] sm:$0xff]  ;;  %v27_v2 = vld [vmem:[%s927_s0 + $0x10] sm:$0xff] }
   0x2   :  { %v690_v3 = vmul.f32 20.0, %v25_v0  ;;  %v692_v4 = vmul.f32 20.0, %v26_v1  ;;  %v694_v5 = vmul.f32 20.0, %v27_v2  ;;  %v28_v6 = vld [vmem:[%s927_s0 + $0x18] sm:$0xff]  ;;  %v29_v7 = vld [vmem:[%s927_s0 + $0x20] sm:$0xff]  ;;  %v30_v8 = vld [vmem:[%s927_s0 + $0x28] sm:$0xff] }
   0x3   :  { %v705_v9 = vmul.f32 20.0, %v28_v6  ;;  %v707_v10 = vmul.f32 20.0, %v29_v7  ;;  %v709_v11 = vmul.f32 20.0, %v30_v8  ;;  %v31_v16 = vld [vmem:[%s927_s0 + $0x30] sm:$0xff]  ;;  %v32_v20 = vld [vmem:[%s927_s0 + $0x38] sm:$0xff] }
   0x4   :  { %v49_v12 = vand.u32 2147483647, %v690_v3  ;;  %v50_v13 = vand.u32 2147483647, %v692_v4  ;;  %v51_v14 = vand.u32 2147483647, %v694_v5 }
   0x5   :  { %v52_v15 = vand.u32 2147483647, %v705_v9  ;;  %v53_v19 = vand.u32 2147483647, %v707_v10  ;;  %v54_v23 = vand.u32 2147483647, %v709_v11 }
   0x6   :  { %v57_v17 = vsub.f32 0.0, %v49_v12  ;;  %v58_v18 = vsub.f32 0.0, %v50_v13  ;;  %v59_v21 = vsub.f32 0.0, %v51_v14  ;;  %v723_v27 = vmul.f32 20.0, %v31_v16 }
   0x7   :  { %v60_v22 = vsub.f32 0.0, %v52_v15  ;;  %v61_v26 = vsub.f32 0.0, %v53_v19  ;;  %v62_v30 = vsub.f32 0.0, %v54_v23  ;;  %v725_v31 = vmul.f32 20.0, %v32_v20 }
   0x8   :  { %v65_v24 = vmul.f32 1.442695, %v57_v17  ;;  %v67_v25 = vmul.f32 1.442695, %v58_v18  ;;  %v69_v28 = vmul.f32 1.442695, %v59_v21 }
   0x9   :  { %v71_v29 = vmul.f32 1.442695, %v60_v22  ;;  %v73_v32 = vmul.f32 1.442695, %v61_v26  ;;  %v55_v33 = vand.u32 2147483647, %v723_v27 }
   0xa   :  { %561 = vpow2.f32 %v65_v24  ;;  %v75_v34 = vmul.f32 1.442695, %v62_v30  ;;  %v56_v35 = vand.u32 2147483647, %v725_v31 }
   0xb   :  { %563 = vpow2.f32 %v67_v25  ;;  %v63_v36 = vsub.f32 0.0, %v55_v33 }
   0xc   :  { %565 = vpow2.f32 %v69_v28 }
   0xd   :  { %12 = vsyncpa [#allocation3], 0  ;;  %567 = vpow2.f32 %v71_v29  ;;  %v64_v37 = vsub.f32 0.0, %v56_v35  ;;  %v77_v38 = vmul.f32 1.442695, %v63_v36  ;;  %v41_v56 = vmax.f32 %v690_v3, 0.0 }
   0xe   :  { %569 = vpow2.f32 %v73_v32  ;;  %v42_v58 = vmax.f32 %v692_v4, 0.0  ;;  %v43_v61 = vmax.f32 %v694_v5, 0.0  ;;  %vm113_vm0 = vcmask 23552   ;;  %s645_s13 = smov [#allocation2]  }
   0xf   :  { %571 = vpow2.f32 %v75_v34  ;;  %v79_v39 = vmul.f32 1.442695, %v64_v37  ;;  %v44_v0 = vmax.f32 %v705_v9, 0.0  ;;  %v45_v7 = vmax.f32 %v707_v10, 0.0  ;;  %v170_v34 = vld [vmem:[%s928_s1] sm:$0xff]  ;;  %s506_s1 = sshll.u32 %s645_s13, 4  ;;  %s507_s1 = int_to_ptr.vmem [resolvable:$true] %s506_s1 }
  0x10   :  { %573 = vpow2.f32 %v77_v38  ;;  %v46_v15 = vmax.f32 %v709_v11, 0.0  ;;  %v47_v10 = vmax.f32 %v723_v27, 0.0  ;;  %v48_v24 = vmax.f32 %v725_v31, 0.0  ;;  %s617_s14 = scalar_lea.vmem %s507_s1, 16  ;;  %s621_s15 = scalar_lea.vmem %s507_s1, 32 }
  0x11   :  { %575 = vpow2.f32 %v79_v39  ;;  %v641_v32 = vmov 1   ;;  %v642_v33 = vmov 0   ;;  %v171_v35 = vmul.f32 20.0, %v170_v34  ;;  %p618_p0 = scmp.ne.s32.totalorder %s507_s1, %s617_s14  ;;  %p622_p1 = scmp.lt.s32.totalorder %s507_s1, %s507_s1 }
  0x12   :  { %542 = vset.pattern.permute.xlu1 %v641_v32  ;;  %541 = vset.pattern.permute.xlu0 %v642_v33  ;;  %vm182_vm1 = vcmask 7168   ;;  %vm194_vm2 = vcmask 0   ;;  %vm480_vm3 = vcmask 130048   ;;  %vm492_vm4 = vcmask 122880   ;;  %p623_p2 = scmp.lt.s32.totalorder %s621_s15, %s617_s14 }
  0x13   :  { %v173_v36 = vand.u32 2147483647, %v171_v35 }
  0x14   :  { %v562_v40 = vpop.eup %561  ;;  %p624_p3 = por %p623_p2, %p622_p1 }
  0x15   :  { %v564_v41 = vpop.eup %563  ;;  %v81_v42 = vadd.f32 1.0, %v562_v40  ;;  %v174_v37 = vsub.f32 0.0, %v173_v36  ;;  %v644_v36 = vmov 0.0  }
  0x16   :  { %v566_v43 = vpop.eup %565  ;;  %v82_v44 = vadd.f32 1.0, %v564_v41  ;;  %195 = vst.msk [vmem:[#allocation2] sm:$0x1] %vm194_vm2, %v644_v36  ;;  %p625_p4 = pnand %p624_p3, %p618_p0 }
  0x17   :  { %v568_v45 = vpop.eup %567  ;;  %577 = vlog2.f32 %v81_v42  ;;  %v83_v46 = vadd.f32 1.0, %v566_v43  ;;  %v175_v38 = vmul.f32 1.442695, %v174_v37  ;;  %v172_v42 = vmax.f32 %v171_v35, 0.0 }
  0x18   :  { %v570_v47 = vpop.eup %569  ;;  %579 = vlog2.f32 %v82_v44  ;;  %v84_v48 = vadd.f32 1.0, %v568_v45 }
  0x19   :  { %v572_v49 = vpop.eup %571  ;;  %581 = vlog2.f32 %v83_v46  ;;  %v85_v50 = vadd.f32 1.0, %v570_v47 }
  0x1a   :  { %v574_v51 = vpop.eup %573  ;;  %583 = vlog2.f32 %v84_v48  ;;  %v86_v52 = vadd.f32 1.0, %v572_v49 }
  0x1b   :  { %v576_v53 = vpop.eup %575  ;;  %585 = vlog2.f32 %v85_v50  ;;  %v87_v54 = vadd.f32 1.0, %v574_v51 }
  0x1c   :  { %587 = vlog2.f32 %v86_v52  ;;  %v88_v55 = vadd.f32 1.0, %v576_v53 }
  0x1d   :  { %589 = vlog2.f32 %v87_v54 }
  0x1e   :  { %591 = vlog2.f32 %v88_v55 }
  0x1f   :  { %593 = vpow2.f32 %v175_v38 }
  0x21   :  { %v578_v57 = vpop.eup %577 }
  0x22   :  { %v580_v59 = vpop.eup %579  ;;  %v90_v60 = vmul.f32 0.6931472, %v578_v57 }
  0x23   :  { %v582_v62 = vpop.eup %581  ;;  %v92_v63 = vmul.f32 0.6931472, %v580_v59 }
  0x24   :  { %v584_v1 = vpop.eup %583  ;;  %v733_v2 = vadd.f32 %v90_v60, %v41_v56  ;;  %v94_v6 = vmul.f32 0.6931472, %v582_v62 }
  0x25   :  { %v586_v8 = vpop.eup %585  ;;  %v736_v3 = vadd.f32 %v92_v63, %v42_v58  ;;  %v96_v12 = vmul.f32 0.6931472, %v584_v1 }
  0x26   :  { %v588_v4 = vpop.eup %587  ;;  %v114_v13 = vsel %vm113_vm0, %v733_v2, 0.0  ;;  %v740_v5 = vadd.f32 %v94_v6, %v43_v61  ;;  %v98_v14 = vmul.f32 0.6931472, %v586_v8 }
  0x27   :  { %v590_v9 = vpop.eup %589  ;;  %115 = vadd.xlane.f32.xlu0 %v114_v13  ;;  %v743_v16 = vadd.f32 %v96_v12, %v44_v0  ;;  %v100_v17 = vmul.f32 0.6931472, %v588_v4  ;;  %v117_v19 = vsel %vm113_vm0, %v736_v3, 0.0 }
  0x28   :  { %v592_v18 = vpop.eup %591  ;;  %v120_v20 = vsel %vm113_vm0, %v740_v5, 0.0  ;;  %v750_v21 = vadd.f32 %v98_v14, %v45_v7  ;;  %v102_v22 = vmul.f32 0.6931472, %v590_v9 }
  0x29   :  { %121 = vadd.xlane.f32.xlu1 %v120_v20  ;;  %v123_v11 = vsel %vm113_vm0, %v743_v16, 0.0  ;;  %v754_v23 = vadd.f32 %v100_v17, %v46_v15  ;;  %v104_v25 = vmul.f32 0.6931472, %v592_v18  ;;  %v594_v39 = vpop.eup %593 }
  0x2a   :  { %v126_v26 = vsel %vm113_vm0, %v750_v21, 0.0  ;;  %v759_v27 = vadd.f32 %v102_v22, %v47_v10  ;;  %v177_v40 = vadd.f32 1.0, %v594_v39 }
  0x2b   :  { %118 = vadd.xlane.f32.xlu0 %v117_v19  ;;  %v129_v28 = vsel %vm113_vm0, %v754_v23, 0.0  ;;  %v763_v29 = vadd.f32 %v104_v25, %v48_v24 }
  0x2c   :  { %v132_v30 = vsel %vm113_vm0, %v759_v27, 0.0  ;;  %595 = vlog2.f32 %v177_v40 }
  0x2d   :  { %124 = vadd.xlane.f32.xlu1 %v123_v11  ;;  %v135_v31 = vsel %vm113_vm0, %v763_v29, 0.0 }
  0x2f   :  { %127 = vadd.xlane.f32.xlu0 %v126_v26 }
  0x31   :  { %130 = vadd.xlane.f32.xlu1 %v129_v28 }
  0x33   :  { %133 = vadd.xlane.f32.xlu0 %v132_v30 }
  0x35   :  { %136 = vadd.xlane.f32.xlu1 %v135_v31 }
  0x36   :  { %v596_v41 = vpop.eup %595 }
  0x37   :  { %v179_v43 = vmul.f32 0.6931472, %v596_v41 }
  0x39   :  { %v180_v44 = vadd.f32 %v179_v43, %v172_v42 }
  0x3b   :  { %v181_v45 = vadd.f32 0.00012487512, %v180_v44 }
  0x3d   :  { %v183_v46 = vsel %vm182_vm1, %v181_v45, 0.0 }
  0x3e   :  { %v184_v47 = vrot.slane %v183_v46, 4 }
  0x40   :  { %v185_v48 = vadd.f32 %v184_v47, %v183_v46  ;;  %v203_v47 = vlaneseq }
  0x42   :  { %v186_v49 = vrot.slane %v185_v48, 2 }
  0x44   :  { %v187_v50 = vadd.f32 %v186_v49, %v185_v48  ;;  %v204_v49 = vshrl.u32 %v203_v47, 7 }
  0x46   :  { %v188_v51 = vrot.slane %v187_v50, 1 }
  0x48   :  { %v189_v52 = vadd.f32 %v188_v51, %v187_v50 }
  0x4a   :  { %v190_v53 = vmax.f32 %v189_v52, 1e-12  ;;  %v857_v52 = vsub.s32 1, %v204_v49 }
  0x4c   :  { %597 = vrcp.f32 %v190_v53  ;;  %v859_v53 = vsub.s32 0, %v204_v49 }
  0x56   :  { %v598_v54 = vpop.eup %597 }
  0x57   :  { %v192_v55 = vmul.f32 %v598_v54, %v181_v45  ;;  %v197_v54 = vld [vmem:[%s929_s2] sm:$0x7] }
  0x59   :  { %193 = vst.msk [vmem:[%s933_s6] sm:$0xff] %vm182_vm1, %v192_v55  ;;  %v523_v55 = vld [vmem:[%s929_s2 + $0x4] sm:$0x7] }
  0x60   :  { %v473_v35 = vld [vmem:[%s933_s6] sm:$0xff] }
  0xb4   :  { %v116_v56 = vpop.xlane.xlu0 %115 }
  0xb5   :  { %v138_v57 = vmax.f32 %v116_v56, 1e-12  ;;  %v249_v56 = vrot.slane %v523_v55, %v857_v52 }
  0xb6   :  { %v122_v58 = vpop.xlane.xlu1 %121 }
  0xb7   :  { %599 = vrcp.f32 %v138_v57  ;;  %v140_v59 = vmax.f32 %v122_v58, 1e-12  ;;  %v868_v57 = vsub.s32 2, %v204_v49  ;;  %v527_v58 = vld [vmem:[%s929_s2 + $0xc] sm:$0x7] }
  0xb8   :  { %v119_v60 = vpop.xlane.xlu0 %118 }
  0xb9   :  { %v139_v61 = vmax.f32 %v119_v60, 1e-12  ;;  %601 = vrcp.f32 %v140_v59  ;;  %v215_v59 = vrot.slane %v197_v54, %v857_v52  ;;  %v206_v60 = vrot.slane %v197_v54, %v859_v53 }
  0xba   :  { %v125_v62 = vpop.xlane.xlu1 %124 }
  0xbb   :  { %603 = vrcp.f32 %v139_v61  ;;  %v141_v63 = vmax.f32 %v125_v62, 1e-12  ;;  %v240_v61 = vrot.slane %v523_v55, %v859_v53  ;;  %v259_v62 = vrot.slane %v523_v55, %v868_v57 }
  0xbc   :  { %v128_v0 = vpop.xlane.xlu0 %127 }
  0xbd   :  { %605 = vrcp.f32 %v141_v63  ;;  %v142_v1 = vmax.f32 %v128_v0, 1e-12  ;;  %v525_v63 = vld [vmem:[%s929_s2 + $0x8] sm:$0x7] }
  0xbe   :  { %v131_v6 = vpop.xlane.xlu1 %130 }
  0xbf   :  { %607 = vrcp.f32 %v142_v1  ;;  %v143_v7 = vmax.f32 %v131_v6, 1e-12  ;;  %v284_v1 = vrot.slane %v525_v63, %v857_v52  ;;  %v310_v6 = vrot.slane %v527_v58, %v859_v53 }
  0xc0   :  { %v134_v8 = vpop.xlane.xlu0 %133 }
  0xc1   :  { %v600_v12 = vpop.eup %599  ;;  %609 = vrcp.f32 %v143_v7  ;;  %v144_v4 = vmax.f32 %v134_v8, 1e-12  ;;  %v319_v7 = vrot.slane %v527_v58, %v857_v52 }
  0xc2   :  { %v147_v13 = vmul.f32 %v600_v12, %v733_v2  ;;  %v137_v14 = vpop.xlane.xlu1 %136 }
  0xc3   :  { %v602_v15 = vpop.eup %601  ;;  %611 = vrcp.f32 %v144_v4  ;;  %v145_v9 = vmax.f32 %v137_v14, 1e-12  ;;  %v225_v4 = vrot.slane %v197_v54, %v868_v57  ;;  %v275_v14 = vrot.slane %v525_v63, %v859_v53 }
  0xc4   :  { %162 = vst.msk [vmem:[%s932_s5] sm:$0xff] %vm113_vm0, %v147_v13  ;;  %v151_v17 = vmul.f32 %v602_v15, %v740_v5  ;;  %v529_v13 = vld [vmem:[%s929_s2 + $0x10] sm:$0x7]  ;;  %v294_v15 = vrot.slane %v525_v63, %v868_v57 }
  0xc5   :  { %v604_v10 = vpop.eup %603  ;;  %613 = vrcp.f32 %v145_v9  ;;  %v329_v9 = vrot.slane %v527_v58, %v868_v57 }
  0xc6   :  { %v149_v18 = vmul.f32 %v604_v10, %v736_v3  ;;  %164 = vst.msk [vmem:[%s932_s5 + $0x10] sm:$0xff] %vm113_vm0, %v151_v17  ;;  %v354_v17 = vrot.slane %v529_v13, %v857_v52  ;;  %v531_v10 = vld [vmem:[%s929_s2 + $0x14] sm:$0x7] }
  0xc7   :  { %v606_v2 = vpop.eup %605  ;;  %v399_v36 = vrot.slane %v531_v10, %v868_v57 }
  0xc8   :  { %163 = vst.msk [vmem:[%s932_s5 + $0x8] sm:$0xff] %vm113_vm0, %v149_v18  ;;  %v153_v19 = vmul.f32 %v606_v2, %v743_v16 }
  0xc9   :  { %v608_v20 = vpop.eup %607 }
  0xca   :  { %165 = vst.msk [vmem:[%s932_s5 + $0x18] sm:$0xff] %vm113_vm0, %v153_v19  ;;  %v155_v3 = vmul.f32 %v608_v20, %v750_v21 }
  0xcb   :  { %v610_v5 = vpop.eup %609  ;;  %v196_v22 = vld [vmem:[%s932_s5] sm:$0xff] }
  0xcc   :  { %209 = vperm.xlu1 %542, %v196_v22   ;;  %200 = vperm.xlu0 %541, %v196_v22   ;;  %166 = vst.msk [vmem:[%s932_s5 + $0x20] sm:$0xff] %vm113_vm0, %v155_v3  ;;  %v157_v16 = vmul.f32 %v610_v5, %v754_v23 }
  0xcd   :  { %v612_v11 = vpop.eup %611  ;;  %v524_v30 = vld [vmem:[%s932_s5 + $0x10] sm:$0xff] }
  0xce   :  { %167 = vst.msk [vmem:[%s932_s5 + $0x28] sm:$0xff] %vm113_vm0, %v157_v16  ;;  %v159_v21 = vmul.f32 %v612_v11, %v759_v27  ;;  %v643_v27 = vmov 2   ;;  %v345_v16 = vrot.slane %v529_v13, %v859_v53 }
  0xcf   :  { %v614_v24 = vpop.eup %613  ;;  %v522_v25 = vld [vmem:[%s932_s5 + $0x8] sm:$0xff] }
  0xd0   :  { %543 = vset.pattern.permute.xlu1 %v642_v33  ;;  %168 = vst.msk [vmem:[%s932_s5 + $0x30] sm:$0xff] %vm113_vm0, %v159_v21  ;;  %v161_v23 = vmul.f32 %v614_v24, %v763_v29  ;;  %v533_v21 = vld [vmem:[%s929_s2 + $0x18] sm:$0x7] }
  0xd1   :  { %234 = vperm.xlu1 %543, %v522_v25   ;;  %v526_v26 = vld [vmem:[%s932_s5 + $0x18] sm:$0xff] }
  0xd2   :  { %304 = vperm.xlu0 %541, %v526_v26   ;;  %169 = vst.msk [vmem:[%s932_s5 + $0x38] sm:$0xff] %vm113_vm0, %v161_v23 }
  0xd3   :  { %v528_v28 = vld [vmem:[%s932_s5 + $0x20] sm:$0xff] }
  0xd5   :  { %544 = vset.pattern.permute.xlu1 %v641_v32  ;;  %v530_v29 = vld [vmem:[%s932_s5 + $0x28] sm:$0xff] }
  0xd6   :  { %243 = vperm.xlu1 %544, %v522_v25   ;;  %550 = vset.pattern.permute.xlu0 %v643_v27 }
  0xd7   :  { %323 = vperm.xlu0 %550, %v526_v26   ;;  %v532_v31 = vld [vmem:[%s932_s5 + $0x30] sm:$0xff] }
  0xd9   :  { %v534_v34 = vld [vmem:[%s932_s5 + $0x38] sm:$0xff] }
  0xda   :  { %545 = vset.pattern.permute.xlu1 %v643_v27 }
  0xdb   :  { %219 = vperm.xlu1 %545, %v196_v22   ;;  %358 = vperm.xlu0 %550, %v528_v28  }
  0xdf   :  { %253 = vperm.xlu1 %545, %v522_v25   ;;  %554 = vset.pattern.permute.xlu0 %v641_v32 }
  0xe0   :  { %383 = vperm.xlu0 %554, %v530_v29  }
  0xe3   :  { %546 = vset.pattern.permute.xlu1 %v642_v33 }
  0xe4   :  { %269 = vperm.xlu1 %546, %v524_v30   ;;  %418 = vperm.xlu0 %554, %v532_v31  }
  0xe8   :  { %547 = vset.pattern.permute.xlu1 %v641_v32  ;;  %558 = vset.pattern.permute.xlu0 %v642_v33 }
  0xe9   :  { %278 = vperm.xlu1 %547, %v524_v30   ;;  %444 = vperm.xlu0 %558, %v534_v34  }
  0xed   :  { %548 = vset.pattern.permute.xlu1 %v643_v27  ;;  %476 = vperm.xlu0 %558, %v473_v35  }
  0xee   :  { %288 = vperm.xlu1 %548, %v524_v30  }
  0xf2   :  { %549 = vset.pattern.permute.xlu1 %v641_v32 }
  0xf3   :  { %313 = vperm.xlu1 %549, %v526_v26   ;;  %v364_v26 = vrot.slane %v529_v13, %v868_v57 }
  0xf7   :  { %551 = vset.pattern.permute.xlu1 %v642_v33 }
  0xf8   :  { %339 = vperm.xlu1 %551, %v528_v28  }
  0xfc   :  { %552 = vset.pattern.permute.xlu1 %v641_v32 }
  0xfd   :  { %348 = vperm.xlu1 %552, %v528_v28  }
 0x101   :  { %553 = vset.pattern.permute.xlu1 %v642_v33 }
 0x102   :  { %374 = vperm.xlu1 %553, %v530_v29  }
 0x106   :  { %555 = vset.pattern.permute.xlu1 %v643_v27 }
 0x107   :  { %393 = vperm.xlu1 %555, %v530_v29  }
 0x10b   :  { %556 = vset.pattern.permute.xlu1 %v642_v33 }
 0x10c   :  { %409 = vperm.xlu1 %556, %v532_v31  }
 0x110   :  { %557 = vset.pattern.permute.xlu1 %v643_v27 }
 0x111   :  { %428 = vperm.xlu1 %557, %v532_v31   ;;  %v389_v31 = vrot.slane %v531_v10, %v857_v52 }
 0x115   :  { %559 = vset.pattern.permute.xlu1 %v641_v32 }
 0x116   :  { %453 = vperm.xlu1 %559, %v534_v34  }
 0x11a   :  { %560 = vset.pattern.permute.xlu1 %v643_v27  ;;  %v380_v27 = vrot.slane %v531_v10, %v859_v53 }
 0x11b   :  { %463 = vperm.xlu1 %560, %v534_v34  }
 0x14b   :  { %v210_v37 = vpop.permute.xlu1 %209  ;;  %v201_v45 = vpop.permute.xlu0 %200 }
 0x14c   :  { %v216_v18 = vmul.f32 %v215_v59, %v210_v37  ;;  %v207_v2 = vmul.f32 %v206_v60, %v201_v45  ;;  %v415_v37 = vrot.slane %v533_v21, %v859_v53  ;;  %v434_v45 = vrot.slane %v533_v21, %v868_v57 }
 0x14e   :  { %v217_v34 = vadd.f32 %v216_v18, %v207_v2 }
 0x150   :  { %v235_v38 = vpop.permute.xlu1 %234 }
 0x151   :  { %v305_v32 = vpop.permute.xlu0 %304  ;;  %v241_v19 = vmul.f32 %v240_v61, %v235_v38 }
 0x152   :  { %v311_v5 = vmul.f32 %v310_v6, %v305_v32 }
 0x155   :  { %v244_v39 = vpop.permute.xlu1 %243 }
 0x156   :  { %v324_v50 = vpop.permute.xlu0 %323  ;;  %v250_v12 = vmul.f32 %v249_v56, %v244_v39 }
 0x158   :  { %v251_v25 = vadd.f32 %v250_v12, %v241_v19 }
 0x15a   :  { %v220_v40 = vpop.permute.xlu1 %219  ;;  %v359_v8 = vpop.permute.xlu0 %358 }
 0x15b   :  { %v226_v23 = vmul.f32 %v225_v4, %v220_v40  ;;  %v424_v40 = vrot.slane %v533_v21, %v857_v52  ;;  %v365_v56 = vmul.f32 %v364_v26, %v359_v8 }
 0x15e   :  { %v254_v41 = vpop.permute.xlu1 %253 }
 0x15f   :  { %v260_v20 = vmul.f32 %v259_v62, %v254_v41  ;;  %v384_v11 = vpop.permute.xlu0 %383 }
 0x160   :  { %v390_v54 = vmul.f32 %v389_v31, %v384_v11 }
 0x161   :  { %v261_v35 = vadd.f32 %v260_v20, %v251_v25  ;;  %v489_v25 = vld [vmem:[%s930_s3] sm:$0x1] }
 0x163   :  { %v270_v42 = vpop.permute.xlu1 %269 }
 0x164   :  { %v276_v28 = vmul.f32 %v275_v14, %v270_v42  ;;  %v535_v42 = vld [vmem:[%s929_s2 + $0x1c] sm:$0x7] }
 0x165   :  { %v459_v58 = vrot.slane %v535_v42, %v857_v52 }
 0x168   :  { %v279_v43 = vpop.permute.xlu1 %278 }
 0x169   :  { %v285_v3 = vmul.f32 %v284_v1, %v279_v43  ;;  %v419_v43 = vpop.permute.xlu0 %418 }
 0x16a   :  { %v425_v62 = vmul.f32 %v424_v40, %v419_v43 }
 0x16b   :  { %v286_v38 = vadd.f32 %v285_v3, %v276_v28 }
 0x16d   :  { %v289_v33 = vpop.permute.xlu1 %288  ;;  %v445_v63 = vpop.permute.xlu0 %444 }
 0x16e   :  { %v295_v29 = vmul.f32 %v294_v15, %v289_v33  ;;  %v227_v33 = vadd.f32 %v226_v23, %v217_v34  ;;  %v490_v23 = vmul.f32 %v489_v25, %v489_v25 }
 0x170   :  { %v296_v32 = vadd.f32 %v295_v29, %v286_v38  ;;  %v262_v55 = vmul.f32 %v261_v35, %v227_v33  ;;  %v496_v29 = vld [vmem:[#allocation2] sm:$0x1] }
 0x171   :  { %v477_v20 = vpop.permute.xlu0 %476 }
 0x172   :  { %v314_v44 = vpop.permute.xlu1 %313  ;;  %v297_v1 = vmul.f32 %v296_v32, %v262_v55 }
 0x173   :  { %v320_v22 = vmul.f32 %v319_v7, %v314_v44  ;;  %v330_v44 = vmul.f32 %v329_v9, %v324_v50 }
 0x175   :  { %v321_v39 = vadd.f32 %v320_v22, %v311_v5 }
 0x177   :  { %v340_v46 = vpop.permute.xlu1 %339  ;;  %v331_v59 = vadd.f32 %v330_v44, %v321_v39 }
 0x178   :  { %v346_v41 = vmul.f32 %v345_v16, %v340_v46  ;;  %v450_v46 = vrot.slane %v535_v42, %v859_v53 }
 0x179   :  { %v332_v13 = vmul.f32 %v331_v59, %v297_v1 }
 0x17a   :  { %v451_v4 = vmul.f32 %v450_v46, %v445_v63 }
 0x17c   :  { %v349_v48 = vpop.permute.xlu1 %348 }
 0x17d   :  { %v355_v30 = vmul.f32 %v354_v17, %v349_v48 }
 0x17f   :  { %v356_v48 = vadd.f32 %v355_v30, %v346_v41 }
 0x181   :  { %v375_v51 = vpop.permute.xlu1 %374  ;;  %v366_v50 = vadd.f32 %v365_v56, %v356_v48 }
 0x182   :  { %v381_v49 = vmul.f32 %v380_v27, %v375_v51  ;;  %v469_v51 = vrot.slane %v535_v42, %v868_v57 }
 0x183   :  { %v367_v53 = vmul.f32 %v366_v50, %v332_v13 }
 0x184   :  { %v391_v6 = vadd.f32 %v390_v54, %v381_v49 }
 0x186   :  { %v394_v0 = vpop.permute.xlu1 %393 }
 0x187   :  { %v400_v60 = vmul.f32 %v399_v36, %v394_v0 }
 0x189   :  { %v401_v14 = vadd.f32 %v400_v60, %v391_v6 }
 0x18b   :  { %v410_v24 = vpop.permute.xlu1 %409  ;;  %v402_v17 = vmul.f32 %v401_v14, %v367_v53 }
 0x18c   :  { %v416_v61 = vmul.f32 %v415_v37, %v410_v24 }
 0x18e   :  { %v426_v8 = vadd.f32 %v425_v62, %v416_v61 }
 0x190   :  { %v429_v47 = vpop.permute.xlu1 %428 }
 0x191   :  { %v435_v7 = vmul.f32 %v434_v45, %v429_v47 }
 0x193   :  { %v436_v9 = vadd.f32 %v435_v7, %v426_v8 }
 0x195   :  { %v454_v12 = vpop.permute.xlu1 %453  ;;  %v437_v18 = vmul.f32 %v436_v9, %v402_v17 }
 0x196   :  { %v460_v15 = vmul.f32 %v459_v58, %v454_v12 }
 0x198   :  { %v461_v0 = vadd.f32 %v460_v15, %v451_v4 }
 0x19a   :  { %v464_v52 = vpop.permute.xlu1 %463 }
 0x19b   :  { %v470_v10 = vmul.f32 %v469_v51, %v464_v52 }
 0x19d   :  { %v471_v2 = vadd.f32 %v470_v10, %v461_v0 }
 0x19f   :  { %v472_v19 = vmul.f32 %v471_v2, %v437_v18 }
 0x1a1   :  { %v479_v3 = vmul.f32 %v477_v20, %v472_v19 }
 0x1a3   :  { %v481_v5 = vsel %vm480_vm3, %v479_v3, 0.0 }
 0x1a4   :  { %v482_v22 = vrot.slane %v481_v5, 4 }
 0x1a6   :  { %v483_v16 = vadd.f32 %v482_v22, %v481_v5 }
 0x1a8   :  { %v484_v57 = vrot.slane %v483_v16, 2 }
 0x1aa   :  { %v485_v11 = vadd.f32 %v484_v57, %v483_v16 }
 0x1ac   :  { %v486_v21 = vrot.slane %v485_v11, 1 }
 0x1ae   :  { %v487_v24 = vadd.f32 %v486_v21, %v485_v11 }
 0x1b0   :  { %615 = vrcp.f32 %v487_v24 }
 0x1ba   :  { %v616_v26 = vpop.eup %615 }
 0x1bb   :  { %v491_v27 = vmul.f32 %v616_v26, %v490_v23 }
 0x1bd   :  { %v493_v28 = vsel %vm492_vm4, %v491_v27, 0.0 }
 0x1be   :  { %494 = vadd.xlane.f32.xlu1 %v493_v28 }
 0x24b   :  { %v495_v30 = vpop.xlane.xlu1 %494 }
 0x24c   :  { %v497_v31 = vadd.f32 %v496_v29, %v495_v30 }
 0x24e   :  { %499 = vst.msk [vmem:[#allocation2] sm:$0x1] %vm194_vm2, %v497_v31 }
 0x24f   :  { %628 = shalt.err (!%p625_p4)
}
 0x250   :  { %s629_s17 = scalar_lea.hbm %s931_s4, 16 }
 0x251   :  { %p630_p5 = scmp.ne.s32.totalorder %s931_s4, %s629_s17  ;;  %p633_p6 = scmp.lt.u32.totalorder %s629_s17, %s931_s4 }
 0x253   :  { %p635_p7 = pnand %p633_p6, %p630_p5 }
 0x255   :  { %638 = shalt.err (!%p635_p7)
}
 0x256   :  { %509 = dma.vmem_to_hbm [thread:$0]  %s507_s1, 16, %s931_s4, [#allocation3]  }
 0x257   :  { %639 = dma.done.wait [#allocation3], 16  }
 0x258   :  { %640 = vsyncadd [#allocation3], 4294967280 }
 0x259   :  { %521 = vsyncpa [#allocation3], 1 }

</bundles_post_ra>
